<compile_context>
chip_gen: v7x
topology: tpu7x:2x2x1
jax: 0.10.0
libtpu: 0.0.40
codegen_flags: <defaults>
</compile_context>

<pallas_src>
import functools

import jax
import jax.numpy as jnp
from jax.experimental import pallas as pl
from jax.experimental.pallas import tpu as pltpu


_CHUNK = 8  # sublane-sized row chunk processed per inner-loop step


def _vmem_limit_bytes():
    # Generation-aware scoped-VMEM limit (v5e/v6e: 128 MiB, v7x: 64 MiB / TC).
    try:
        cap = pltpu.get_tpu_info().vmem_capacity_bytes
    except Exception:  # conservative fallback if the query is unavailable
        cap = 64 * 1024 * 1024
    return int(min(64 * 1024 * 1024, cap // 2))


def _retnref_loss_kernel(scores_ref, labels_ref, ll_ref, *, null_idx, tile, chunk):
    # scores_ref: (1, tile, V)   logits in their input dtype (f32 or bf16).
    #             The final seq tile may be partial; out-of-bounds rows hold
    #             unspecified data but their (padded) labels are NULL_IDX, so
    #             they contribute exactly zero.
    # labels_ref: (1, S_pad, 1)  int32 labels for the whole (b, c) row; the
    #             block index is seq-invariant, so it is DMA'd once per row
    #             and stays VMEM-resident.
    # ll_ref:     (1, 1, 1)      f32 log-likelihood accumulator (VMEM-resident
    #             across the seq axis).
    s_idx = pl.program_id(1)

    @pl.when(s_idx == 0)
    def _init():
        ll_ref[...] = jnp.zeros_like(ll_ref)

    v = scores_ref.shape[-1]
    n_chunks = tile // chunk
    base = s_idx * tile  # offset of this seq tile inside the resident labels row

    # Hoisted once per grid step: a small (chunk, V) iota reused by every
    # inner-loop step (JAX does not CSE broadcast_in_dim inside loops).
    vocab_iota = jax.lax.broadcasted_iota(jnp.int32, (chunk, v), 1)

    def body(c, acc):
        r0 = pl.multiple_of(c * chunk, chunk)
        x = scores_ref[0, pl.ds(r0, chunk), :]                           # (chunk, V)
        lab = labels_ref[0, pl.ds(pl.multiple_of(base + r0, chunk), chunk), :]

        # max and the one-hot gather are rounding-free -> do them in the input
        # dtype (packed bf16 vregs halve VALU/vld work on v6e/v7x).
        m = jnp.max(x, axis=-1, keepdims=True)                           # (chunk, 1)
        tgt = jnp.sum(
            jnp.where(vocab_iota == lab, x, jnp.zeros((), x.dtype)),
            axis=-1, keepdims=True)                                      # (chunk, 1)

        # exp / log-sum-exp chain in f32 (matches the f32 reference numerics).
        mf = m.astype(jnp.float32)
        e = jnp.exp(x.astype(jnp.float32) - mf)
        lse = mf + jnp.log(jnp.sum(e, axis=-1, keepdims=True))           # (chunk, 1)

        per_tok = jnp.where(lab != null_idx,
                            lse - tgt.astype(jnp.float32), 0.0)          # (chunk, 1)
        return acc + jnp.sum(per_tok)

    total = jax.lax.fori_loop(0, n_chunks, body, jnp.zeros((), jnp.float32),
                              unroll=True)
    ll_ref[...] += total


def retnref_loss(scores, candidate_scores, labels, *, null_idx,
                 tile_s=None, target_block_bytes=4 * 1024 * 1024,
                 max_tile_rows=512):
    """Pallas implementation of RetnrefLoss.forward.

    Returns (final_loss [bsz], log_likelihood_loss [bsz, num_cands]), both f32.
    """
    del candidate_scores  # only its shape is used in the original module
    B, C, S, V = scores.shape
    assert labels.shape == (B, C, S)

    BC = B * C
    scores2 = scores.reshape(BC, S, V)          # free reshape; input dtype kept
    labels2 = labels.reshape(BC, S).astype(jnp.int32)

    # --- seq tiling: multiple-of-8 tile within a byte budget that keeps the
    # double-buffered scores block small enough for v7x's 64 MiB VMEM.
    chunk = min(_CHUNK, S)
    itemsize = jnp.dtype(scores.dtype).itemsize
    rows_budget = (target_block_bytes // max(1, V * itemsize)) // chunk * chunk
    max_rows = max(chunk, min(max_tile_rows, rows_budget))
    if S <= chunk:
        tile = S                      # block == full seq dim (OK even if S % 8 != 0)
    else:
        cap = (S // chunk) * chunk    # largest multiple of 8 not exceeding S
        if tile_s is not None:
            tile = max(chunk, min((tile_s // chunk) * chunk, cap))
        else:
            tile = min(max_rows, cap)

    grid_s = pl.cdiv(S, tile)
    s_pad = grid_s * tile

    # Only the (tiny) labels are padded — padded rows get NULL_IDX so that the
    # unspecified out-of-bounds scores of a partial final tile contribute
    # exactly zero.  scores are NOT padded / copied in HBM.
    if s_pad != S:
        labels2 = jnp.pad(labels2, ((0, 0), (0, s_pad - S)),
                          constant_values=null_idx)
    labels3 = labels2[..., None]                # (BC, S_pad, 1)

    grid = (BC, grid_s)
    kernel = functools.partial(_retnref_loss_kernel, null_idx=null_idx,
                               tile=tile, chunk=chunk)

    ll3 = pl.pallas_call(
        kernel,
        out_shape=jax.ShapeDtypeStruct((BC, 1, 1), jnp.float32),
        grid_spec=pltpu.PrefetchScalarGridSpec(
            num_scalar_prefetch=0,
            grid=grid,
            in_specs=[
                # scores: one seq tile per step, vocab full & lane-major.
                pl.BlockSpec((1, tile, V), lambda i, s: (i, s, 0)),
                # labels: full row, seq-invariant index -> fetched once per row.
                pl.BlockSpec((1, s_pad, 1), lambda i, s: (i, 0, 0)),
            ],
            out_specs=pl.BlockSpec((1, 1, 1), lambda i, s: (i, 0, 0)),
        ),
        compiler_params=pltpu.CompilerParams(
            dimension_semantics=("parallel", "arbitrary"),
            vmem_limit_bytes=_vmem_limit_bytes(),
        ),
    )(scores2, labels3)

    ll = ll3.reshape(B, C)
    final_loss = ll.sum(-1)        # trivial O(B*C) sum, left to XLA
    return final_loss, ll


def _reference(scores, labels, null_idx):
    # Pure-JAX reference of CrossEntropy(ignore_index, reduction='none') + sums.
    logp = jax.nn.log_softmax(scores.astype(jnp.float32), axis=-1)
    tgt = jnp.take_along_axis(logp, labels[..., None].astype(jnp.int32),
                              axis=-1)[..., 0]
    per_tok = jnp.where(labels != null_idx, -tgt, 0.0)
    ll = per_tok.sum(-1)
    return ll.sum(-1), ll


if __name__ == "__main__":
    NULL_IDX = 0
    key = jax.random.PRNGKey(0)

    # (B, C, S, V, dtype) — small shapes.  The second case exercises a ragged
    # final seq tile (S=20, tile=16) without any scores padding; the third
    # exercises the bf16 input path.
    cases = [
        (2, 3, 8, 32, jnp.float32),
        (1, 2, 20, 160, jnp.float32),
        (2, 2, 16, 256, jnp.bfloat16),
    ]

    for (B, C, S, V, dt) in cases:
        key, k1, k2, k3 = jax.random.split(key, 4)
        scores = jax.random.normal(k1, (B, C, S, V), dtype=jnp.float32).astype(dt)
        candidate_scores = jax.random.normal(k2, (B, C), dtype=jnp.float32)
        labels = jax.random.randint(k3, (B, C, S), 0, V, dtype=jnp.int32)

        final_loss, ll_loss = retnref_loss(
            scores, candidate_scores, labels, null_idx=NULL_IDX
        )
        jax.block_until_ready((final_loss, ll_loss))

        ref_final, ref_ll = _reference(scores, labels, NULL_IDX)
        assert jnp.allclose(ll_loss, ref_ll, atol=1e-3, rtol=1e-3), (B, C, S, V, dt)
        assert jnp.allclose(final_loss, ref_final, atol=1e-3, rtol=1e-3), (B, C, S, V, dt)

    print("KERNEL_OK")
</pallas_src>

<mosaic_0001>
module attributes {stable_mosaic.version = 11 : i64} {
  func.func @_retnref_loss_kernel(%arg0: i32, %arg1: i32, %arg2: memref<1x8x32xf32, #tpu.memory_space<vmem>>, %arg3: memref<1x8x1xi32, #tpu.memory_space<vmem>>, %arg4: memref<1x1x1xf32, #tpu.memory_space<vmem>>) attributes {dimension_semantics = [#tpu.dimension_semantics<parallel>, #tpu.dimension_semantics<arbitrary>], iteration_bounds = array<i64: 6, 1>, scalar_prefetch = 0 : i64, scratch_operands = 0 : i64, tpu.core_type = #tpu.core_type<tc>, window_params = [{transform_indices = @transform_0, window_bounds = array<i64: 1, 8, 32>}, {transform_indices = @transform_1, window_bounds = array<i64: 1, 8, 1>}, {transform_indices = @transform_2, window_bounds = array<i64: 1, 1, 1>}]} {
    %c0_i32 = arith.constant 0 : i32
    %0 = arith.cmpi eq, %arg1, %c0_i32 : i32
    %1 = arith.extui %0 : i1 to i32
    %c0_i32_0 = arith.constant 0 : i32
    %2 = arith.cmpi ne, %1, %c0_i32_0 : i32
    scf.if %2 {
      %cst_19 = arith.constant 0.000000e+00 : f32
      %44 = vector.broadcast %cst_19 : f32 to vector<1x1x1xf32>
      %c0_20 = arith.constant 0 : index
      %c0_21 = arith.constant 0 : index
      %c0_22 = arith.constant 0 : index
      %45 = vector.load %arg4[%c0_20, %c0_21, %c0_22] : memref<1x1x1xf32, #tpu.memory_space<vmem>>, vector<1x1x1xf32>
      tpu.vector_store %arg4[%c0_20, %c0_21, %c0_22], %44 {strides = array<i32>} : memref<1x1x1xf32, #tpu.memory_space<vmem>>, vector<1x1x1xf32>,
    } else {
    }
    %c8_i32 = arith.constant 8 : i32
    %3 = arith.muli %arg1, %c8_i32 : i32
    %4 = tpu.iota {dimensions = array<i32: 1>} : vector<8x32xi32>
    %cst = arith.constant 0.000000e+00 : f32
    %c0_i32_1 = arith.constant 0 : i32
    %c8_i32_2 = arith.constant 8 : i32
    %5 = arith.muli %c0_i32_1, %c8_i32_2 : i32
    %6 = tpu.assume_multiple %5, 8 : i32
    %c0 = arith.constant 0 : index
    %7 = arith.index_cast %6 : i32 to index
    %c0_3 = arith.constant 0 : index
    %8 = vector.load %arg2[%c0, %7, %c0_3] : memref<1x8x32xf32, #tpu.memory_space<vmem>>, vector<1x8x32xf32>
    %9 = vector.shape_cast %8 : vector<1x8x32xf32> to vector<8x32xf32>
    %10 = arith.addi %3, %6 : i32
    %11 = tpu.assume_multiple %10, 8 : i32
    %c0_4 = arith.constant 0 : index
    %12 = arith.index_cast %11 : i32 to index
    %c0_5 = arith.constant 0 : index
    %13 = vector.load %arg3[%c0_4, %12, %c0_5] : memref<1x8x1xi32, #tpu.memory_space<vmem>>, vector<1x8x1xi32>
    %14 = vector.shape_cast %13 : vector<1x8x1xi32> to vector<8x1xi32>
    %cst_6 = arith.constant dense<0xFF800000> : vector<8xf32>
    %15 = vector.multi_reduction <maximumf>, %9, %cst_6 [1] : vector<8x32xf32> to vector<8xf32>
    %16 = vector.shape_cast %15 : vector<8xf32> to vector<8x1xf32>
    %17 = vector.broadcast %14 : vector<8x1xi32> to vector<8x32xi32>
    %18 = arith.cmpi eq, %4, %17 : vector<8x32xi32>
    %cst_7 = arith.constant 0.000000e+00 : f32
    %19 = vector.broadcast %cst_7 : f32 to vector<8x32xf32>
    %20 = arith.select %18, %9, %19 : vector<8x32xi1>, vector<8x32xf32>
    %cst_8 = arith.constant dense<0.000000e+00> : vector<8xf32>
    %21 = vector.multi_reduction <add>, %20, %cst_8 [1] : vector<8x32xf32> to vector<8xf32>
    %22 = vector.shape_cast %21 : vector<8xf32> to vector<8x1xf32>
    %23 = vector.broadcast %16 : vector<8x1xf32> to vector<8x32xf32>
    %24 = arith.subf %9, %23 : vector<8x32xf32>
    %25 = math.exp %24 : vector<8x32xf32>
    %cst_9 = arith.constant dense<0.000000e+00> : vector<8xf32>
    %26 = vector.multi_reduction <add>, %25, %cst_9 [1] : vector<8x32xf32> to vector<8xf32>
    %27 = vector.shape_cast %26 : vector<8xf32> to vector<8x1xf32>
    %28 = math.log %27 : vector<8x1xf32>
    %29 = arith.addf %16, %28 : vector<8x1xf32>
    %c0_i32_10 = arith.constant 0 : i32
    %30 = vector.broadcast %c0_i32_10 : i32 to vector<8x1xi32>
    %31 = arith.cmpi ne, %14, %30 : vector<8x1xi32>
    %32 = arith.subf %29, %22 : vector<8x1xf32>
    %cst_11 = arith.constant 0.000000e+00 : f32
    %33 = vector.broadcast %cst_11 : f32 to vector<8x1xf32>
    %34 = arith.select %31, %32, %33 : vector<8x1xi1>, vector<8x1xf32>
    %35 = vector.shape_cast %34 : vector<8x1xf32> to vector<1x8x1xf32>
    %cst_12 = arith.constant dense<0.000000e+00> : vector<1xf32>
    %36 = vector.multi_reduction <add>, %35, %cst_12 [1, 2] : vector<1x8x1xf32> to vector<1xf32>
    %37 = vector.shape_cast %36 : vector<1xf32> to vector<1x1x1xf32>
    %38 = vector.extract %37[0, 0, 0] : f32 from vector<1x1x1xf32>
    %39 = arith.addf %cst, %38 : f32
    %c1_i32 = arith.constant 1 : i32
    %c0_13 = arith.constant 0 : index
    %c0_14 = arith.constant 0 : index
    %c0_15 = arith.constant 0 : index
    %40 = vector.load %arg4[%c0_13, %c0_14, %c0_15] : memref<1x1x1xf32, #tpu.memory_space<vmem>>, vector<1x1x1xf32>
    %41 = vector.broadcast %39 : f32 to vector<1x1x1xf32>
    %42 = arith.addf %40, %41 : vector<1x1x1xf32>
    %c0_16 = arith.constant 0 : index
    %c0_17 = arith.constant 0 : index
    %c0_18 = arith.constant 0 : index
    %43 = vector.load %arg4[%c0_16, %c0_17, %c0_18] : memref<1x1x1xf32, #tpu.memory_space<vmem>>, vector<1x1x1xf32>
    tpu.vector_store %arg4[%c0_16, %c0_17, %c0_18], %42 {strides = array<i32>} : memref<1x1x1xf32, #tpu.memory_space<vmem>>, vector<1x1x1xf32>,
    return
  }
  func.func @transform_0(%arg0: i32, %arg1: i32) -> (i32, i32, i32) {
    %c0_i32 = arith.constant 0 : i32
    %c0_i32_0 = arith.constant 0 : i32
    return %arg0, %arg1, %c0_i32 : i32, i32, i32
  }
  func.func @transform_1(%arg0: i32, %arg1: i32) -> (i32, i32, i32) {
    %c0_i32 = arith.constant 0 : i32
    %c0_i32_0 = arith.constant 0 : i32
    %c0_i32_1 = arith.constant 0 : i32
    return %arg0, %c0_i32, %c0_i32_0 : i32, i32, i32
  }
  func.func @transform_2(%arg0: i32, %arg1: i32) -> (i32, i32, i32) {
    %c0_i32 = arith.constant 0 : i32
    %c0_i32_0 = arith.constant 0 : i32
    %c0_i32_1 = arith.constant 0 : i32
    return %arg0, %c0_i32, %c0_i32_0 : i32, i32, i32
  }
}

</mosaic_0001>

<bundles_post_ra>
// kernel: tpu_custom_call.1
= control target key start
LH: loop header
LB: loop body
LE: loop exit
PB: predicated region body
PF: predicated region fallthrough
CT: control target
= control target key end

     0   :  { %s386_s9 = smov 0   ;;  %s388_s10 = smov 0   ;;  %s429_s0 = inlined_call_operand.vmem [shape: f32[6,8,32], index: 0, kind: input, shape index: {}]   ;;  %s430_s1 = inlined_call_operand.vmem [shape: s32[6,8,1], index: 1, kind: input, shape index: {}]   ;;  %s431_s2 = inlined_call_operand.vmem [shape: f32[6,1,1], index: 2, kind: output, shape index: {}]  }
   0x1   :  { %s390_s11 = smov 0  }
   0x2 LB: > { %s24_s12 = sadd.s32 1, %s363_s10  ;;  %p307_p0 = scmp.ge.s32.totalorder %s367_s11, 1  ;;  %s367_s11 = sphi %s390_s11, %s12_s11   ;;  %s363_s10 = sphi %s388_s10, %s433_s10   ;;  %s359_s9 = sphi %s386_s9, %s432_s9  }
   0x3   : > { %p26_p1 = scmp.ge.s32.totalorder %s24_s12, 6  ;;  %p137_p2 = scmp.lt.s32.totalorder %s367_s11, 7 }
   0x5   : > { %s435_s12 = smov (%p26_p1, %s24_s12), 0  ;;  %p138_p3 = pnand %p307_p0, %p137_p2 }
   0x6   : > { %p163_p4 = scmp.lt.s32.totalorder (!%p138_p3), %s359_s9, 5  ;;  %v369_v0 = vmov (!%p138_p3), 0   ;;  %vm190_vm0 = vcmask (!%p138_p3), 261120   ;;  %v184_v7 = vlaneseq (!%p138_p3)  ;;  %vm214_vm3 = vcmask (!%p138_p3), 7168  }
   0x7   : > { %141 = sbr.rel (%p138_p3) target bundleno = 546 (0x222), region = 28  ;;  %340 = vset.pattern.permute.xlu0 (!%p138_p3), %v369_v0  ;;  %vm181_vm4 = vcmask (!%p138_p3), 0   ;;  %v370_v22 = vmov (!%p138_p3), 0.0  }
   0x8   : > { %v185_v8 = vand.u32 (!%p138_p3), 127, %v184_v7 }
   0xe   : > { %s437_s9 = smov (!%p163_p4, %s359_s9), 5 }
   0xf   : > { %s308_s13 = sshll.u32 %s437_s9, 3  ;;  %s176_s22 = scalar_lea.vmem %s431_s2, %s437_s9 }
  0x10   : > { %s169_s16 = scalar_lea.vmem %s429_s0, %s308_s13  ;;  %s173_s19 = scalar_lea.vmem %s430_s1, %s308_s13  ;;  %182 = vst.msk [vmem:[%s176_s22] sm:$0x1] %vm181_vm4, %v370_v22 }
  0x11   : > { %v186_v1 = vld [vmem:[%s169_s16] sm:$0xff] }
  0x12   : > { %v191_v2 = vsel %vm190_vm0, %v186_v1, -inf  ;;  %v189_v3 = vld [vmem:[%s173_s19] sm:$0xff] }
  0x13   : > { %192 = vmax.xlane.f32.xlu0 %v191_v2  ;;  %vm211_vm2 = vcmp.ne.s32.totalorder %v189_v3, 0 }
  0x17   : > { %v226_v30 = vld [vmem:[%s176_s22] sm:$0x1] }
  0x29   : > { %195 = vperm.xlu0 %340, %v189_v3  }
  0xa0   : > { %v193_v4 = vpop.xlane.xlu0 %192 }
  0xa1   : > { %v202_v5 = vsub.f32 %v186_v1, %v193_v4 }
  0xa3   : > { %v203_v6 = vmul.f32 1.442695, %v202_v5 }
  0xa5   : > { %341 = vpow2.f32 %v203_v6 }
  0xa8   : > { %v196_v9 = vpop.permute.xlu0 %195 }
  0xa9   : > { %vm197_vm1 = vcmp.eq.s32.totalorder %v185_v8, %v196_v9 }
  0xaa   : > { %v198_v11 = vsel %vm197_vm1, %v186_v1, 0.0 }
  0xab   : > { %v199_v13 = vsel %vm190_vm0, %v198_v11, 0.0 }
  0xaf   : > { %v342_v10 = vpop.eup %341 }
  0xb0   : > { %v205_v12 = vsel %vm190_vm0, %v342_v10, 0.0 }
  0xb1   : > { %206 = vadd.xlane.f32.xlu1 %v205_v12 }
  0xb5   : > { %200 = vadd.xlane.f32.xlu1 %v199_v13 }
 0x13e   : > { %v207_v14 = vpop.xlane.xlu1 %206 }
 0x13f   : > { %343 = vlog2.f32 %v207_v14 }
 0x142   : > { %v201_v17 = vpop.xlane.xlu1 %200 }
 0x149   : > { %v344_v15 = vpop.eup %343 }
 0x14a   : > { %v209_v16 = vmul.f32 0.6931472, %v344_v15 }
 0x14c   : > { %v210_v18 = vadd.f32 %v209_v16, %v193_v4 }
 0x14e   : > { %v212_v19 = vsub.f32 %v210_v18, %v201_v17 }
 0x150   : > { %v213_v20 = vsel %vm211_vm2, %v212_v19, 0.0 }
 0x151   : > { %v215_v21 = vsel %vm214_vm3, %v213_v20, 0.0 }
 0x152   : > { %216 = vadd.xlane.f32.xlu1 %v215_v21 }
 0x1df   : > { %v217_v23 = vpop.xlane.xlu1 %216 }
 0x1e0   : > { %v218_v24 = vrot.slane %v217_v23, 4 }
 0x1e2   : > { %v219_v25 = vadd.f32 %v218_v24, %v217_v23 }
 0x1e4   : > { %v220_v26 = vrot.slane %v219_v25, 2 }
 0x1e6   : > { %v221_v27 = vadd.f32 %v220_v26, %v219_v25 }
 0x1e8   : > { %v222_v28 = vrot.slane %v221_v27, 1 }
 0x1ea   : > { %v223_v29 = vadd.f32 %v222_v28, %v221_v27 }
 0x1ec   : > { %312 = vpush %v223_v29 }
 0x21d   : > { %s313_s23 = spop %312 }
 0x21e   : > { %v227_v31 = vstv %s313_s23 }
 0x21f   : > { %v228_v32 = vadd.f32 %v227_v31, %v226_v30 }
 0x221   : > { %230 = vst.msk [vmem:[%s176_s22] sm:$0x1] %vm181_vm4, %v228_v32 }
 0x222 PF: > { %s12_s11 = sadd.s32 1, %s367_s11   ;;  %s432_s9 = smov %s363_s10 }
 0x223   : > { %p9_p5 = scmp.ge.s32.totalorder %s12_s11, 8   ;;  %s433_s10 = smov %s435_s12 }
 0x225   :  { %11 = sbr.rel (!%p9_p5) target bundleno = 2 (0x2), region = 66 }

</bundles_post_ra>
